<compile_context>
chip_gen: v7x
topology: tpu7x:2x2x1
jax: 0.10.0
libtpu: 0.0.40
codegen_flags: <defaults>
</compile_context>

<pallas_src>
import math

import jax
import jax.numpy as jnp
from jax import lax
from jax.experimental import pallas as pl
from jax.experimental.pallas import tpu as pltpu

NEG_SLOPE = 0.01                       # nn.LeakyReLU default negative_slope
ACC_BUDGET = 2 * 1024 * 1024           # f32 conv accumulator budget per tile
NORM_BUDGET = 4 * 1024 * 1024          # per-block budget for norm/apply kernels
VMEM_LIMIT = 64 * 1024 * 1024          # fits v7x physical VMEM, plenty on v5e/v6e

# ---- constants copied from the PyTorch module -------------------------------------------
P_LEN = 2 * (512 * 2 * 5 + 512 + 256 + 256 + 128 + 128 + 64 + 64 + 32 + 32)   # 13184
_raw = [0, 512 * 4, 512 * 4, 512 * 4, 512 * 4, 512 * 4,
        512 * 2 + 256 * 2, 256 * 2 + 128 * 2, 128 * 2 + 64 * 2, 64 * 2 + 32 * 2, 32 * 2]
SLICE_IDX = list(_raw)
for _i in range(1, len(SLICE_IDX)):
    SLICE_IDX[_i] = SLICE_IDX[_i - 1] + SLICE_IDX[_i]


def _cparams(*sem):
    return pltpu.CompilerParams(dimension_semantics=sem, vmem_limit_bytes=VMEM_LIMIT)


# ======================================= conv kernel =====================================

def conv2d(x, w, b, pad, *, pre_lrelu=False, post_sigmoid=False, out_dtype=jnp.bfloat16):
    """Stride-1 'same' conv, NHWC.  In-kernel reduction over the kh*kw taps on a
    row-flattened activation view (no HBM im2col blow-up).  bf16 operands, f32 acc."""
    B, H, W, Cin = x.shape
    KH, KW, _, Cout = w.shape
    Hp = H + 2 * pad

    xb = x.astype(jnp.bfloat16)
    if pad:
        xb = jnp.pad(xb, ((0, 0), (pad, pad), (0, 0), (0, 0)))      # pad rows only
    xf = xb.reshape(B, Hp * W, Cin)
    if pad:
        xf = jnp.pad(xf, ((0, 0), (pad, pad), (0, 0)))              # flat pad for col taps
    L = Hp * W + 2 * pad
    wt = w.reshape(KH * KW, Cin, Cout).astype(jnp.bfloat16)
    bv = b.reshape(1, Cout).astype(jnp.float32)

    # tile over output rows, bounded by an f32 accumulator budget
    tile_h = H
    while (tile_h % 2 == 0 and ((tile_h // 2) * W) % 8 == 0
           and tile_h * W * Cout * 4 > ACC_BUDGET):
        tile_h //= 2
    n_h = H // tile_h
    M = tile_h * W

    def kernel(x_ref, w_ref, b_ref, o_ref, acc_ref):
        m0 = pl.program_id(1) * M
        acc_ref[...] = jnp.zeros_like(acc_ref)
        if pad > 0:
            wcol = lax.broadcasted_iota(jnp.int32, (M, 1), 0) % W
        for i in range(KH):
            for j in range(KW):
                patch = x_ref[0, pl.ds(m0 + i * W + j, M), :]          # [M, Cin] bf16
                if pre_lrelu:
                    # LeakyReLU(0) == 0 so the zero padding stays correct.
                    patch = jnp.where(patch >= 0, patch, NEG_SLOPE * patch)
                if pad > 0 and j != pad:
                    # mask columns whose width-tap falls into the (virtual) zero pad
                    valid = jnp.logical_and(wcol >= (pad - j), wcol < (W + pad - j))
                    patch = jnp.where(valid, patch, jnp.zeros_like(patch))
                acc_ref[...] += jnp.dot(patch, w_ref[i * KW + j],
                                        preferred_element_type=jnp.float32)
        out = acc_ref[...] + b_ref[...]
        if post_sigmoid:
            # exact divide (EUP exp + reciprocal); safe: denom >= 1 -> result in [0, 1]
            out = pl.reciprocal(1.0 + jnp.exp(-out), approx=False)
        o_ref[0] = out.astype(o_ref.dtype)

    out = pl.pallas_call(
        kernel,
        out_shape=jax.ShapeDtypeStruct((B, H * W, Cout), out_dtype),
        grid=(B, n_h),
        in_specs=[
            pl.BlockSpec((1, L, Cin), lambda bi, mi: (bi, 0, 0)),       # resident per batch
            pl.BlockSpec((KH * KW, Cin, Cout), lambda bi, mi: (0, 0, 0)),
            pl.BlockSpec((1, Cout), lambda bi, mi: (0, 0)),
        ],
        out_specs=pl.BlockSpec((1, M, Cout), lambda bi, mi: (bi, mi, 0)),
        scratch_shapes=[pltpu.VMEM((M, Cout), jnp.float32)],
        compiler_params=_cparams("parallel", "parallel"),
    )(xf, wt, bv)
    return out.reshape(B, H, W, Cout)


# ======================================= norm kernels ====================================

def _spatial_tile(hw, c, bytes_per, budget=NORM_BUDGET):
    t = hw
    while t % 2 == 0 and (t // 2) % 8 == 0 and t * c * bytes_per > budget:
        t //= 2
    return t


def norm_stats(xf, *, unbiased, eps=1e-5):
    """Per-(batch, channel) spatial mean and reciprocal scale r.
       unbiased=True  -> r = 1/(sqrt(unbiased var) + eps)   (adaIN / torch.std)
       unbiased=False -> r = rsqrt(biased var + eps)        (nn.InstanceNorm2d)"""
    B, HW, C = xf.shape
    thw = _spatial_tile(HW, C, 4)
    n_hw = HW // thw

    def kernel(x_ref, mean_ref, r_ref, sum_ref, ssq_ref):
        k = pl.program_id(1)

        @pl.when(k == 0)
        def _():
            sum_ref[...] = jnp.zeros_like(sum_ref)
            ssq_ref[...] = jnp.zeros_like(ssq_ref)

        xv = x_ref[0].astype(jnp.float32)                      # [thw, C]
        sum_ref[...] += jnp.sum(xv, axis=0, keepdims=True)
        ssq_ref[...] += jnp.sum(xv * xv, axis=0, keepdims=True)

        @pl.when(k == pl.num_programs(1) - 1)
        def _():
            mean = sum_ref[...] * (1.0 / HW)
            var = jnp.maximum(ssq_ref[...] * (1.0 / HW) - mean * mean, 0.0)
            if unbiased:
                var = var * (HW / (HW - 1.0))
                r = 1.0 / (jnp.sqrt(var) + eps)
            else:
                r = lax.rsqrt(var + eps)
            mean_ref[0] = mean
            r_ref[0] = r

    return pl.pallas_call(
        kernel,
        out_shape=(jax.ShapeDtypeStruct((B, 1, C), jnp.float32),
                   jax.ShapeDtypeStruct((B, 1, C), jnp.float32)),
        grid=(B, n_hw),
        in_specs=[pl.BlockSpec((1, thw, C), lambda bi, k: (bi, k, 0))],
        out_specs=(pl.BlockSpec((1, 1, C), lambda bi, k: (bi, 0, 0)),
                   pl.BlockSpec((1, 1, C), lambda bi, k: (bi, 0, 0))),
        scratch_shapes=[pltpu.VMEM((1, C), jnp.float32),
                        pltpu.VMEM((1, C), jnp.float32)],
        compiler_params=_cparams("parallel", "arbitrary"),
    )(xf)


def affine_apply(xf, scale, shift, *, lrelu, out_dtype=jnp.bfloat16):
    """out = lrelu?(x * scale + shift), tiled over the spatial axis."""
    B, HW, C = xf.shape
    thw = _spatial_tile(HW, C, 4)
    n_hw = HW // thw

    def kernel(x_ref, a_ref, c_ref, o_ref):
        xv = x_ref[0].astype(jnp.float32)
        out = xv * a_ref[0] + c_ref[0]
        if lrelu:
            out = jnp.where(out >= 0, out, NEG_SLOPE * out)
        o_ref[0] = out.astype(o_ref.dtype)

    return pl.pallas_call(
        kernel,
        out_shape=jax.ShapeDtypeStruct((B, HW, C), out_dtype),
        grid=(B, n_hw),
        in_specs=[pl.BlockSpec((1, thw, C), lambda bi, k: (bi, k, 0)),
                  pl.BlockSpec((1, 1, C), lambda bi, k: (bi, 0, 0)),
                  pl.BlockSpec((1, 1, C), lambda bi, k: (bi, 0, 0))],
        out_specs=pl.BlockSpec((1, thw, C), lambda bi, k: (bi, k, 0)),
        compiler_params=_cparams("parallel", "parallel"),
    )(xf, scale, shift)


def adain(x, mean_s, std_s, *, lrelu=False, eps=1e-5):
    B, H, W, C = x.shape
    assert H * W > 1
    xf = x.reshape(B, H * W, C)
    mean, r = norm_stats(xf, unbiased=True, eps=eps)
    scale = std_s.reshape(B, 1, C).astype(jnp.float32) * r
    shift = mean_s.reshape(B, 1, C).astype(jnp.float32) - mean * scale
    return affine_apply(xf, scale, shift, lrelu=lrelu).reshape(B, H, W, C)


def instance_norm(x, pr, *, eps=1e-5):
    B, H, W, C = x.shape
    xf = x.reshape(B, H * W, C)
    mean, r = norm_stats(xf, unbiased=False, eps=eps)
    scale = pr["w"].reshape(1, 1, C) * r
    shift = pr["b"].reshape(1, 1, C) - mean * scale
    return affine_apply(xf, scale, shift, lrelu=False).reshape(B, H, W, C)


# ======================================= attention =======================================

def self_attention(x, pr):
    """SelfAttention with query-tiled scores: only a [tq, N] tile of the score matrix is
    ever resident.  softmax(dim=-2) of the torch code == softmax over the key axis here."""
    B, H, W, C = x.shape
    N = H * W
    xf = x.reshape(B, N, C).astype(jnp.bfloat16)
    C8 = pr["wf"].shape[1]
    tq = N
    while tq > 1024 and tq % 2 == 0:
        tq //= 2
    n_q = N // tq

    wf = pr["wf"].astype(jnp.bfloat16)
    wg = pr["wg"].astype(jnp.bfloat16)
    wh = pr["wh"].astype(jnp.bfloat16)
    bf = pr["bf"].astype(jnp.float32)
    bg = pr["bg"].astype(jnp.float32)
    bh = pr["bh"].astype(jnp.float32)
    gamma = pr["gamma"].reshape(1, 1).astype(jnp.float32)

    def kernel(xa_ref, xq_ref, wf_ref, bf_ref, wg_ref, bg_ref, wh_ref, bh_ref,
               gm_ref, o_ref):
        xa = xa_ref[0]                                                     # [N, C]
        xq = xq_ref[0]                                                     # [tq, C]
        f = jnp.dot(xa, wf_ref[...], preferred_element_type=jnp.float32) + bf_ref[...]
        h = jnp.dot(xa, wh_ref[...], preferred_element_type=jnp.float32) + bh_ref[...]
        g = jnp.dot(xq, wg_ref[...], preferred_element_type=jnp.float32) + bg_ref[...]
        # attT[q, i] == attention_map[i, q] of the torch code
        attT = lax.dot_general(g, f, (((1,), (1,)), ((), ())),
                               preferred_element_type=jnp.float32)         # [tq, N]
        attT = attT - jnp.max(attT, axis=1, keepdims=True)
        attT = jnp.exp(attT)
        attT = attT * pl.reciprocal(jnp.sum(attT, axis=1, keepdims=True), approx=True)
        out = jnp.dot(attT.astype(jnp.bfloat16), h.astype(jnp.bfloat16),
                      preferred_element_type=jnp.float32)                  # [tq, C]
        o_ref[0] = (gm_ref[...] * out + xq.astype(jnp.float32)).astype(o_ref.dtype)

    out = pl.pallas_call(
        kernel,
        out_shape=jax.ShapeDtypeStruct((B, N, C), jnp.bfloat16),
        grid=(B, n_q),
        in_specs=[
            pl.BlockSpec((1, N, C), lambda bi, qi: (bi, 0, 0)),   # full x (keys/values)
            pl.BlockSpec((1, tq, C), lambda bi, qi: (bi, qi, 0)),  # query tile
            pl.BlockSpec((C, C8), lambda bi, qi: (0, 0)),
            pl.BlockSpec((1, C8), lambda bi, qi: (0, 0)),
            pl.BlockSpec((C, C8), lambda bi, qi: (0, 0)),
            pl.BlockSpec((1, C8), lambda bi, qi: (0, 0)),
            pl.BlockSpec((C, C), lambda bi, qi: (0, 0)),
            pl.BlockSpec((1, C), lambda bi, qi: (0, 0)),
            pl.BlockSpec((1, 1), lambda bi, qi: (0, 0)),
        ],
        out_specs=pl.BlockSpec((1, tq, C), lambda bi, qi: (bi, qi, 0)),
        compiler_params=_cparams("parallel", "parallel"),
    )(xf, xf, wf, bf, wg, bg, wh, bh, gamma)
    return out.reshape(B, H, W, C)


# ======================================= style matmul ====================================

def style_matmul(e2d, pT):
    """e_psi = e[B,512] @ p^T[512,P_LEN] : lane-dense output (P_LEN = 103*128)."""
    B, K = e2d.shape
    _, N = pT.shape
    tn = 128

    def kernel(a_ref, w_ref, o_ref):
        o_ref[...] = jnp.dot(a_ref[...], w_ref[...], preferred_element_type=jnp.float32)

    return pl.pallas_call(
        kernel,
        out_shape=jax.ShapeDtypeStruct((B, N), jnp.float32),
        grid=(N // tn,),
        in_specs=[pl.BlockSpec((B, K), lambda ni: (0, 0)),
                  pl.BlockSpec((K, tn), lambda ni: (0, ni))],
        out_specs=pl.BlockSpec((B, tn), lambda ni: (0, ni)),
        compiler_params=_cparams("parallel"),
    )(e2d, pT)


# ======================================= glue =============================================

def avg_pool2(x):                                   # nn.AvgPool2d(2): pure data movement
    B, H, W, C = x.shape
    return x.reshape(B, H // 2, 2, W // 2, 2, C).mean(axis=(2, 4))


def upsample_bilinear(x, hn, wn):                   # nn.Upsample(mode='bilinear')
    B, _, _, C = x.shape
    return jax.image.resize(x.astype(jnp.float32), (B, hn, wn, C),
                            method="bilinear").astype(jnp.bfloat16)


# ======================================= blocks ==========================================

def res_block_down(x, pr):
    out_res = conv2d(x, pr["l1"]["w"], pr["l1"]["b"], pad=0)
    out_res = avg_pool2(out_res)
    out = conv2d(x, pr["r1"]["w"], pr["r1"]["b"], pad=pr["pad"], pre_lrelu=True)
    out = conv2d(out, pr["r2"]["w"], pr["r2"]["b"], pad=pr["pad"], pre_lrelu=True)
    out = avg_pool2(out)
    return out_res + out


def res_block(x, psi, pr):
    Cp = psi.shape[1]
    out = adain(x, psi[:, :Cp // 4], psi[:, Cp // 4:Cp // 2], lrelu=True)   # adaIN+relu
    out = conv2d(out, pr["c1"]["w"], pr["c1"]["b"], pad=1)
    out = adain(out, psi[:, Cp // 2:3 * Cp // 4], psi[:, 3 * Cp // 4:], lrelu=True)
    out = conv2d(out, pr["c2"]["w"], pr["c2"]["b"], pad=1)
    return out + x


def res_block_up(x, psi, pr, out_size=None):
    in_c, out_c = pr["in_c"], pr["out_c"]
    mean1, std1 = psi[:, :in_c], psi[:, in_c:2 * in_c]
    mean2 = psi[:, 2 * in_c:2 * in_c + out_c]
    std2 = psi[:, 2 * in_c + out_c:2 * (in_c + out_c)]
    B, H, W, _ = x.shape
    hn, wn = (2 * H, 2 * W) if out_size is None else out_size
    # left
    out_res = upsample_bilinear(x, hn, wn)
    out_res = conv2d(out_res, pr["l1"]["w"], pr["l1"]["b"], pad=0)
    # right
    out = adain(x, mean1, std1, lrelu=True)                                 # adaIN+relu
    out = upsample_bilinear(out, hn, wn)
    out = conv2d(out, pr["r1"]["w"], pr["r1"]["b"], pad=pr["pad"])
    out = adain(out, mean2, std2, lrelu=True)                               # adaIN+relu
    out = conv2d(out, pr["r2"]["w"], pr["r2"]["b"], pad=pr["pad"])
    return out + out_res


# ======================================= params ==========================================

def _conv_init(key, kh, kw, cin, cout):
    kwk, kbk = jax.random.split(key)
    w = (jax.random.normal(kwk, (kh, kw, cin, cout), jnp.float32)
         / math.sqrt(kh * kw * cin)).astype(jnp.bfloat16)
    b = 0.01 * jax.random.normal(kbk, (cout,), jnp.float32)
    return {"w": w, "b": b}


def _resdown_init(key, cin, cout, k, pad):
    k1, k2, k3 = jax.random.split(key, 3)
    return {"l1": _conv_init(k1, 1, 1, cin, cout),
            "r1": _conv_init(k2, k, k, cin, cout),
            "r2": _conv_init(k3, k, k, cout, cout), "pad": pad}


def _resblock_init(key, c):
    k1, k2 = jax.random.split(key)
    return {"c1": _conv_init(k1, 3, 3, c, c), "c2": _conv_init(k2, 3, 3, c, c)}


def _resup_init(key, cin, cout, k=3, pad=1):
    k1, k2, k3 = jax.random.split(key, 3)
    return {"l1": _conv_init(k1, 1, 1, cin, cout),
            "r1": _conv_init(k2, k, k, cin, cout),
            "r2": _conv_init(k3, k, k, cout, cout),
            "in_c": cin, "out_c": cout, "pad": pad}


def _attn_init(key, c):
    c8 = c // 8
    k1, k2, k3 = jax.random.split(key, 3)
    return {"wf": (jax.random.normal(k1, (c, c8), jnp.float32) / math.sqrt(c)).astype(jnp.bfloat16),
            "bf": jnp.zeros((1, c8), jnp.float32),
            "wg": (jax.random.normal(k2, (c, c8), jnp.float32) / math.sqrt(c)).astype(jnp.bfloat16),
            "bg": jnp.zeros((1, c8), jnp.float32),
            "wh": (jax.random.normal(k3, (c, c), jnp.float32) / math.sqrt(c)).astype(jnp.bfloat16),
            "bh": jnp.zeros((1, c), jnp.float32),
            "gamma": jnp.zeros((1, 1), jnp.float32)}        # matches PyTorch init (0.0)


def _inorm_init(c):
    return {"w": jnp.ones((c,), jnp.float32), "b": jnp.zeros((c,), jnp.float32)}


def init_params(key, inc=20, out_size=256):
    ks = jax.random.split(key, 16)
    return {
        "out_size": out_size,
        "resDown1": _resdown_init(ks[0], inc, 64, 9, 4),
        "in1": _inorm_init(64),
        "resDown2": _resdown_init(ks[1], 64, 128, 3, 1),
        "in2": _inorm_init(128),
        "resDown3": _resdown_init(ks[2], 128, 256, 3, 1),
        "in3": _inorm_init(256),
        "attD": _attn_init(ks[3], 256),
        "resDown4": _resdown_init(ks[4], 256, 512, 3, 1),
        "in4": _inorm_init(512),
        "res1": _resblock_init(ks[5], 512),
        "res2": _resblock_init(ks[6], 512),
        "res3": _resblock_init(ks[7], 512),
        "res4": _resblock_init(ks[8], 512),
        "resUp1": _resup_init(ks[9], 512, 256),
        "resUp2": _resup_init(ks[10], 256, 128),
        "attU": _attn_init(ks[11], 128),
        "resUp3": _resup_init(ks[12], 128, 64),
        "resUp4": _resup_init(ks[13], 64, 32, k=3, pad=1),
        "convF": _conv_init(ks[14], 3, 3, 32, 3),
        # stored transposed once at init so the P_LEN axis is lane-dense in the matmul
        "pT": 0.02 * jax.random.normal(ks[15], (512, P_LEN), jnp.float32),
    }


# ======================================= forward =========================================

def direct_generator_forward(params, y_nchw, e):
    """y: [B, inc, H, W] (NCHW like PyTorch), e: [B, 512, 1].  Returns NCHW image."""
    x = jnp.transpose(y_nchw, (0, 2, 3, 1)).astype(jnp.bfloat16)            # NHWC bf16

    # e_psi = bmm(p.expand(B), e)  ==  e @ p^T with lane-dense P_LEN output
    e_psi = style_matmul(e[:, :, 0].astype(jnp.float32), params["pT"])      # [B, P_LEN]

    si = SLICE_IDX
    out = res_block_down(x, params["resDown1"])
    out = instance_norm(out, params["in1"])
    out = res_block_down(out, params["resDown2"])
    out = instance_norm(out, params["in2"])
    out = res_block_down(out, params["resDown3"])
    out = instance_norm(out, params["in3"])
    out = self_attention(out, params["attD"])
    out = res_block_down(out, params["resDown4"])
    out = instance_norm(out, params["in4"])

    out = res_block(out, e_psi[:, si[0]:si[1]], params["res1"])
    out = res_block(out, e_psi[:, si[1]:si[2]], params["res2"])
    out = res_block(out, e_psi[:, si[2]:si[3]], params["res3"])
    out = res_block(out, e_psi[:, si[3]:si[4]], params["res4"])

    out = res_block_up(out, e_psi[:, si[5]:si[6]], params["resUp1"])
    out = res_block_up(out, e_psi[:, si[6]:si[7]], params["resUp2"])
    out = self_attention(out, params["attU"])
    out = res_block_up(out, e_psi[:, si[7]:si[8]], params["resUp3"])
    out = res_block_up(out, e_psi[:, si[8]:si[9]], params["resUp4"],
                       out_size=(params["out_size"], params["out_size"]))

    mid = (si[10] + si[9]) // 2
    out = adain(out, e_psi[:, si[9]:mid], e_psi[:, mid:si[10]], lrelu=True)  # adaIN + relu
    out = conv2d(out, params["convF"]["w"], params["convF"]["b"], pad=1,
                 post_sigmoid=True, out_dtype=jnp.float32)                   # conv + sigmoid
    return jnp.transpose(out, (0, 3, 1, 2))                                  # back to NCHW


# ======================================= main ============================================

if __name__ == "__main__":
    B, INC, H_IN, OUT_SIZE = 2, 20, 32, 32   # small shapes consistent with the module
    key = jax.random.PRNGKey(0)
    kp, ky, ke = jax.random.split(key, 3)

    params = init_params(kp, inc=INC, out_size=OUT_SIZE)
    y = jax.random.normal(ky, (B, INC, H_IN, H_IN), jnp.float32)
    e = jax.random.normal(ke, (B, 512, 1), jnp.float32)

    out = direct_generator_forward(params, y, e)
    out = jax.block_until_ready(out)

    assert out.shape == (B, 3, OUT_SIZE, OUT_SIZE)
    assert bool(jnp.all(jnp.isfinite(out)))
    assert bool(jnp.all((out >= 0.0) & (out <= 1.0)))   # sigmoid output range
    print("KERNEL_OK")
</pallas_src>

<mosaic_0001>
module attributes {stable_mosaic.version = 11 : i64} {
  func.func @kernel(%arg0: i32, %arg1: memref<2x512xf32, #tpu.memory_space<vmem>>, %arg2: memref<512x128xf32, #tpu.memory_space<vmem>>, %arg3: memref<2x128xf32, #tpu.memory_space<vmem>>) attributes {dimension_semantics = [#tpu.dimension_semantics<parallel>], iteration_bounds = array<i64: 103>, scalar_prefetch = 0 : i64, scratch_operands = 0 : i64, tpu.core_type = #tpu.core_type<tc>, window_params = [{pipeline_mode = #tpu.pipeline_mode<synchronous>, transform_indices = @transform_0, window_bounds = array<i64: 2, 512>}, {transform_indices = @transform_1, window_bounds = array<i64: 512, 128>}, {transform_indices = @transform_2, window_bounds = array<i64: 2, 128>}]} {
    %c0 = arith.constant 0 : index
    %c0_0 = arith.constant 0 : index
    %0 = vector.load %arg1[%c0, %c0_0] : memref<2x512xf32, #tpu.memory_space<vmem>>, vector<2x512xf32>
    %c0_1 = arith.constant 0 : index
    %c0_2 = arith.constant 0 : index
    %1 = vector.load %arg2[%c0_1, %c0_2] : memref<512x128xf32, #tpu.memory_space<vmem>>, vector<512x128xf32>
    %cst = arith.constant dense<0.000000e+00> : vector<2x128xf32>
    %2 = tpu.matmul %0, %1, %cst {dimension_numbers = #tpu.dot_dimension_numbers<[1], [0], [0], [1], [0, 0, 1, 1], [], []>} : vector<2x512xf32>, vector<512x128xf32>, vector<2x128xf32> -> vector<2x128xf32>
    %c0_3 = arith.constant 0 : index
    %c0_4 = arith.constant 0 : index
    %3 = vector.load %arg3[%c0_3, %c0_4] : memref<2x128xf32, #tpu.memory_space<vmem>>, vector<2x128xf32>
    tpu.vector_store %arg3[%c0_3, %c0_4], %2 {strides = array<i32>} : memref<2x128xf32, #tpu.memory_space<vmem>>, vector<2x128xf32>,
    return
  }
  func.func @transform_0(%arg0: i32) -> (i32, i32) {
    %c0_i32 = arith.constant 0 : i32
    %c0_i32_0 = arith.constant 0 : i32
    %c0_i32_1 = arith.constant 0 : i32
    return %c0_i32, %c0_i32_0 : i32, i32
  }
  func.func @transform_1(%arg0: i32) -> (i32, i32) {
    %c0_i32 = arith.constant 0 : i32
    %c0_i32_0 = arith.constant 0 : i32
    return %c0_i32, %arg0 : i32, i32
  }
  func.func @transform_2(%arg0: i32) -> (i32, i32) {
    %c0_i32 = arith.constant 0 : i32
    %c0_i32_0 = arith.constant 0 : i32
    return %c0_i32, %arg0 : i32, i32
  }
}

</mosaic_0001>

<bundles_post_ra>
// kernel: tpu_custom_call.1
= control target key start
LH: loop header
LB: loop body
LE: loop exit
PB: predicated region body
PF: predicated region fallthrough
CT: control target
= control target key end

     0   :  { %7 = vsyncpa [#allocation3], 0  ;;  %s1121_s0 = inlined_call_operand.hbm [shape: f32[2,512], index: 0, kind: input, shape index: {}]   ;;  %s1122_s1 = inlined_call_operand.hbm [shape: f32[512,13184], index: 1, kind: input, shape index: {}]   ;;  %s1123_s2 = inlined_call_operand.hbm [shape: f32[2,13184], index: 2, kind: output, shape index: {}]  }
   0x1   :  { %8 = vsyncpa [#allocation6], 0 }
   0x2   :  { %10 = vsyncpa [#allocation6 + $0x1], 0 }
   0x3   :  { %11 = vsyncpa [#allocation4], 0 }
   0x4   :  { %13 = vsyncpa [#allocation4 + $0x1], 0  ;;  %s860_s9 = smov 0   ;;  %s862_s10 = smov 0  }
   0x5   :  { %s864_s11 = smov 0   ;;  %s866_s12 = smov 0  }
   0x6 LB: > { %s881_s13 = sadd.s32 4294967295, %s836_s12   ;;  %s498_s14 = sadd.s32 4294967294, %s836_s12   ;;  %s836_s12 = sphi %s866_s12, %s1146_s12   ;;  %s832_s11 = sphi %s864_s11, %s1145_s11   ;;  %s828_s10 = sphi %s862_s10, %s1144_s10   ;;  %s824_s9 = sphi %s860_s9, %s1143_s9  }
   0x7   : > { %s885_s15 = sadd.s32 1, %s836_s12   ;;  %s47_s16 = sadd.s32 1, %s832_s11 }
   0x8   : > { %s44_s17 = ssub.s32 %s836_s12, %s885_s15  ;;  %p54_p0 = scmp.ne.s32.totalorder %s832_s11, %s828_s10 }
   0x9   : > { %p45_p1 = scmp.eq.s32.totalorder %s44_s17, 0  ;;  %p55_p2 = scmp.eq.s32.totalorder %s836_s12, 0 }
   0xa   : > { %p60_p3 = scmp.ne.s32.totalorder %s828_s10, %s824_s9  ;;  %p1124_p4 = scmp.eq.s32.totalorder %s881_s13, 0 }
   0xb   : > { %s897_s18 = scalar_select %p45_p1, %s832_s11, %s47_s16  }
   0xc   : > { %p899_p5 = por %p55_p2, %p54_p0  ;;  %p905_p6 = por %p1124_p4, %p60_p3 }
   0xd   : > { %p84_p7 = scmp.eq.s32.totalorder %s881_s13, 102  ;;  %p90_p8 = scmp.eq.s32.totalorder %s498_s14, 102 }
   0xe   : > { %s1130_s20 = scalar_select %p905_p6, 1, 0 }
   0xf   : > { %p499_p9 = scmp.ge.s32.totalorder %s836_s12, 1  ;;  %p97_p10 = scmp.lt.s32.totalorder %s836_s12, 104 }
  0x10   : > { %p912_p11 = por %p84_p7, %p54_p0  ;;  %p916_p12 = por %p90_p8, %p60_p3 }
  0x11   : > { %p920_p13 = pnand %p499_p9, %p97_p10  ;;  %s838_s24 = smov [#allocation2]  }
  0x12   : > { %s1131_s21 = scalar_select %p912_p11, 1, 0 }
  0x13   : > { %s1132_s22 = scalar_select %p916_p12, 1, 0 }
  0x14   : > { %s1133_s23 = scalar_select %p920_p13, 1, 0 }
  0x15   : > { %p654_p1 = pneg %p920_p13  ;;  %s110_s25 = sshll.u32 %s838_s24, 4  ;;  %s111_s25 = int_to_ptr.vmem [resolvable:$true] %s110_s25 }
  0x16   : > { %p667_p2 = scmp.lt.s32.totalorder %s836_s12, 103  ;;  %s121_s27 = sand.u32 1, %s832_s11  }
  0x17   : > { %p929_p0 = pnand %p654_p1, %p1124_p4  ;;  %s502_s29 = sshll.u32 %s121_s27, 9 }
  0x18   : > { %p936_p3 = pnand %p667_p2, %p899_p5  ;;  %s708_s4 = scalar_lea.hbm %s1121_s0, 128 }
  0x19   : > { %p709_p7 = scmp.ne.s32.totalorder %s1121_s0, %s708_s4  ;;  %p710_p8 = pneg %p929_p0 }
  0x1a   : > { %s1135_s28 = scalar_select %p936_p3, 1, 0 }
  0x1b   : > { %p711_p9 = pnand %p710_p8, %p709_p7  ;;  %p715_p5 = scmp.lt.u32.totalorder %s708_s4, %s1121_s0 }
  0x1d   : > { %p712_p10 = pneg %p711_p9 }
  0x1f   : > { %p717_p1 = pnand %p715_p5, %p712_p10 }
  0x21   : > { %720 = shalt.err (!%p717_p1)
}
  0x22   : > { %s721_s14 = scalar_lea.vmem %s111_s25, 128  ;;  %p729_p11 = scmp.lt.s32.totalorder %s111_s25, %s111_s25 }
  0x23   : > { %p722_p2 = scmp.ne.s32.totalorder %s111_s25, %s721_s14  ;;  %p730_p6 = scmp.lt.s32.totalorder %s721_s14, %s721_s14 }
  0x25   : > { %p724_p4 = pnand %p722_p2, %p710_p8  ;;  %p731_p13 = por %p730_p6, %p729_p11 }
  0x27   : > { %p725_p12 = pneg %p724_p4 }
  0x29   : > { %p732_p3 = pnand %p731_p13, %p725_p12 }
  0x2b   : > { %735 = shalt.err (!%p732_p3)
}
  0x2c   : > { %657 = dma.hbm_to_vmem [thread:$0]  (!%p929_p0), %s1121_s0, 128, %s111_s25, [#allocation3]  }
  0x2d   : > { %s503_s19 = sshll.u32 %s836_s12, 7  ;;  %s125_s24 = scalar_lea.vmem [#allocation5], %s502_s29 }
  0x2e   : > { %s131_s30 = sshll.u32 %s125_s24, 4  ;;  %s960_s5 = scalar_lea.hbm %s1122_s1, %s503_s19  ;;  %s962_s30 = int_to_ptr.vmem [resolvable:$true] %s131_s30 }
  0x2f   : > { %s964_s26 = scalar_lea.sflag [#allocation6], %s121_s27  ;;  %s736_s6 = scalar_lea.hbm %s960_s5, 8192 }
  0x30   : > { %p737_p4 = scmp.ne.s32.totalorder %s960_s5, %s736_s6  ;;  %p1136_p6 = scmp.ne.s32.totalorder %s1135_s28, 0 }
  0x31   : > { %s741_s7 = scalar_lea.hbm %s1122_s1, 843776  ;;  %p742_p0 = scmp.lt.u32.totalorder %s960_s5, %s1122_s1 }
  0x32   : > { %p738_p11 = pneg %p1136_p6  ;;  %p743_p3 = scmp.lt.u32.totalorder %s741_s7, %s736_s6 }
  0x33   : > { %p745_p8 = scmp.lt.u32.totalorder %s736_s6, %s960_s5 }
  0x34   : > { %p739_p12 = pnand %p738_p11, %p737_p4  ;;  %p744_p7 = por %p743_p3, %p742_p0 }
  0x36   : > { %p740_p13 = pneg %p739_p12  ;;  %p746_p9 = por %p745_p8, %p744_p7 }
  0x38   : > { %p747_p10 = pnand %p746_p9, %p740_p13 }
  0x3a   : > { %750 = shalt.err (!%p747_p10)
}
  0x3b   : > { %s751_s27 = scalar_lea.vmem %s962_s30, 8192  ;;  %s839_s16 = smov [#allocation5]  }
  0x3c   : > { %p752_p5 = scmp.ne.s32.totalorder %s962_s30, %s751_s27  ;;  %s756_s17 = sshll.u32 %s839_s16, 4  ;;  %s757_s17 = int_to_ptr.vmem [resolvable:$false] %s756_s17 }
  0x3d   : > { %s758_s19 = scalar_lea.vmem %s757_s17, 16384  ;;  %p759_p4 = scmp.lt.s32.totalorder %s962_s30, %s757_s17 }
  0x3e   : > { %p754_p1 = pnand %p752_p5, %p738_p11  ;;  %p760_p12 = scmp.lt.s32.totalorder %s758_s19, %s751_s27 }
  0x40   : > { %p755_p2 = pneg %p754_p1  ;;  %p761_p0 = por %p760_p12, %p759_p4 }
  0x42   : > { %p762_p3 = pnand %p761_p0, %p755_p2 }
  0x44   : > { %765 = shalt.err (!%p762_p3)
}
  0x45   : > { %s840_s24 = smov 13184   ;;  %s841_s3 = smov 128  }
  0x46   : > { %s842_s4 = smov 8   ;;  %p1137_p11 = scmp.ne.s32.totalorder %s1133_s23, 0 }
  0x47   : > { %661 = dma.hbm_to_vmem [thread:$0]  (!%p1136_p6), %s960_s5, 8192, %s962_s30, %s964_s26, %s840_s24, %s841_s3, %s842_s4  }
  0x48   : > { %143 = sbr.rel (%p1137_p11) target bundleno = 352 (0x160), region = 28  ;;  %p1138_p13 = scmp.eq.s32.totalorder (!%p1137_p11), %s881_s13, 0 }
  0x4f   : > { %811 = dma.done.wait (%p1138_p13), [#allocation3], 128   ;;  %p1139_p7 = pmov %p1138_p13 }
  0x50   : > { %s999_s6 = sand.u32 1, %s828_s10   ;;  %p1140_p6 = scmp.ne.s32.totalorder %s1130_s20, 0 }
  0x51   : > { %813 = vsyncadd (%p1139_p7), [#allocation3], 4294967168  ;;  %s506_s25 = sshll.u32 %s999_s6, 9  ;;  %s150_s29 = scalar_lea.sflag [#allocation6], %s999_s6 }
  0x52   : > { %s1003_s7 = scalar_lea.vmem [#allocation5], %s506_s25 }
  0x53   : > { %815 = dma.done.wait (%p1140_p6), %s150_s29, 8192  }
  0x54   : > { %817 = vsyncadd (%p1140_p6), %s150_s29, 4294959104  ;;  %v191_v0 = vld [vmem:[%s1003_s7 + $0x80] sm:$0xff]  ;;  %v192_v1 = vld [vmem:[%s1003_s7 + $0x88] sm:$0xff]  ;;  %v843_v47 = vmov 1983009808   ;;  %v244_v49 = vlaneseq  ;;  %s507_s20 = sshll.u32 %s999_s6, 1 }
  0x55   : > { %v223_v2 = vld [vmem:[%s1003_s7 + $0x180] sm:$0xff]  ;;  %v582_v3 = vpack.c.bf16 %v192_v1, %v191_v0  ;;  %v224_v4 = vld [vmem:[%s1003_s7 + $0x188] sm:$0xff]  ;;  %v193_v11 = vld [vmem:[%s1003_s7 + $0x90] sm:$0xff]  ;;  %v242_v48 = vunpack.c.l.s4 %v843_v47  ;;  %s509_s23 = sshll.u32 %s881_s13, 5  ;;  %s173_s28 = scalar_lea.vmem [#allocation7], %s507_s20 }
  0x56   : > { %v175_v5 = vld [vmem:[%s1003_s7] sm:$0xff]  ;;  %v176_v6 = vld [vmem:[%s1003_s7 + $0x8] sm:$0xff]  ;;  %v614_v7 = vpack.c.bf16 %v224_v4, %v223_v2  ;;  %v194_v13 = vld [vmem:[%s1003_s7 + $0x98] sm:$0xff]  ;;  %v245_v0 = vshrl.u32 %v244_v49, 7  ;;  %s416_s30 = sshll.u32 %s173_s28, 4  ;;  %s1078_s8 = scalar_lea.hbm %s1123_s2, %s509_s23  ;;  %s1080_s30 = int_to_ptr.vmem [resolvable:$true] %s416_s30 }
  0x57   : > { %v584_v8 = vpack.c.bf16 %v176_v6, %v175_v5  ;;  %v207_v9 = vld [vmem:[%s1003_s7 + $0x100] sm:$0xff]  ;;  %v208_v10 = vld [vmem:[%s1003_s7 + $0x108] sm:$0xff]  ;;  %583 = vmatprep.subr.bf16.mxu0 %v582_v3  ;;  %v225_v14 = vld [vmem:[%s1003_s7 + $0x190] sm:$0xff]  ;;  %v586_v16 = vpack.c.bf16 %v194_v13, %v193_v11  ;;  %v243_v63 = vunpack.c.0.s8 %v242_v48  ;;  %s403_s14 = scalar_lea.sflag [#allocation4], %s999_s6  ;;  %s766_s27 = scalar_lea.vmem %s1080_s30, 32 }
  0x58   : > { %v616_v12 = vpack.c.bf16 %v208_v10, %v207_v9  ;;  %v226_v15 = vld [vmem:[%s1003_s7 + $0x198] sm:$0xff]  ;;  %615 = vmatprep.subr.bf16.mxu1 %v614_v7  ;;  %v177_v18 = vld [vmem:[%s1003_s7 + $0x10] sm:$0xff]  ;;  %v195_v23 = vld [vmem:[%s1003_s7 + $0xa0] sm:$0xff]  ;;  %p767_p8 = scmp.ne.s32.totalorder %s1080_s30, %s766_s27  ;;  %p1141_p9 = scmp.ne.s32.totalorder %s1131_s21, 0 }
  0x59   : > { %585 = vmatpush3.bf16.msra.mxu0 %v584_v8  ;;  %v618_v17 = vpack.c.bf16 %v226_v15, %v225_v14  ;;  %v178_v19 = vld [vmem:[%s1003_s7 + $0x18] sm:$0xff]  ;;  %v209_v20 = vld [vmem:[%s1003_s7 + $0x110] sm:$0xff]  ;;  %v196_v24 = vld [vmem:[%s1003_s7 + $0xa8] sm:$0xff]  ;;  %v246_v13 = vsub.s32 %v243_v63, %v245_v0  ;;  %s844_s13 = smov [#allocation7]  }
  0x5a   : > { %617 = vmatpush3.bf16.msra.mxu1 %v616_v12  ;;  %v588_v21 = vpack.c.bf16 %v178_v19, %v177_v18  ;;  %v210_v22 = vld [vmem:[%s1003_s7 + $0x118] sm:$0xff]  ;;  %587 = vmatprep.subr.bf16.mxu0 %v586_v16  ;;  %v590_v26 = vpack.c.bf16 %v196_v24, %v195_v23  ;;  %v227_v27 = vld [vmem:[%s1003_s7 + $0x1a0] sm:$0xff]  ;;  %v228_v28 = vld [vmem:[%s1003_s7 + $0x1a8] sm:$0xff]  ;;  %p768_p10 = pnand %p767_p8, %p1141_p9  ;;  %s770_s16 = sshll.u32 %s844_s13, 4  ;;  %s771_s16 = int_to_ptr.vmem [resolvable:$false] %s770_s16 }
  0x5b   : > { %619 = vmatprep.subr.bf16.mxu1 %v618_v17  ;;  %v620_v25 = vpack.c.bf16 %v210_v22, %v209_v20  ;;  %v179_v29 = vld [vmem:[%s1003_s7 + $0x20] sm:$0xff]  ;;  %v622_v30 = vpack.c.bf16 %v228_v28, %v227_v27  ;;  %v180_v31 = vld [vmem:[%s1003_s7 + $0x28] sm:$0xff]  ;;  %v197_v35 = vld [vmem:[%s1003_s7 + $0xb0] sm:$0xff]  ;;  %s772_s17 = scalar_lea.vmem %s771_s16, 64  ;;  %p773_p1 = scmp.lt.s32.totalorder %s1080_s30, %s771_s16 }
  0x5c   : > { %v211_v32 = vld [vmem:[%s1003_s7 + $0x120] sm:$0xff]  ;;  %v212_v33 = vld [vmem:[%s1003_s7 + $0x128] sm:$0xff]  ;;  %v592_v34 = vpack.c.bf16 %v180_v31, %v179_v29  ;;  %v198_v36 = vld [vmem:[%s1003_s7 + $0xb8] sm:$0xff]  ;;  %p769_p5 = pneg %p768_p10  ;;  %p774_p2 = scmp.lt.s32.totalorder %s772_s17, %s766_s27 }
  0x5d   : > { %589 = vmatpush3.bf16.msra.mxu0 %v588_v21  ;;  %v229_v37 = vld [vmem:[%s1003_s7 + $0x1b0] sm:$0xff]  ;;  %v624_v38 = vpack.c.bf16 %v212_v33, %v211_v32  ;;  %v594_v39 = vpack.c.bf16 %v198_v36, %v197_v35  ;;  %v230_v40 = vld [vmem:[%s1003_s7 + $0x1b8] sm:$0xff]  ;;  %v199_v46 = vld [vmem:[%s1003_s7 + $0xc0] sm:$0xff] }
  0x5e   : > { %621 = vmatpush3.bf16.msra.mxu1 %v620_v25  ;;  %591 = vmatprep.subr.bf16.mxu0 %v590_v26  ;;  %v181_v41 = vld [vmem:[%s1003_s7 + $0x30] sm:$0xff]  ;;  %v182_v42 = vld [vmem:[%s1003_s7 + $0x38] sm:$0xff]  ;;  %v626_v43 = vpack.c.bf16 %v230_v40, %v229_v37  ;;  %v200_v50 = vld [vmem:[%s1003_s7 + $0xc8] sm:$0xff]  ;;  %p775_p4 = por %p774_p2, %p773_p1 }
  0x5f   : > { %623 = vmatprep.subr.bf16.mxu1 %v622_v30  ;;  %v213_v44 = vld [vmem:[%s1003_s7 + $0x130] sm:$0xff]  ;;  %v214_v45 = vld [vmem:[%s1003_s7 + $0x138] sm:$0xff]  ;;  %v231_v51 = vld [vmem:[%s1003_s7 + $0x1c0] sm:$0xff]  ;;  %v596_v53 = vpack.c.bf16 %v182_v42, %v181_v41  ;;  %v598_v55 = vpack.c.bf16 %v200_v50, %v199_v46 }
  0x60   : > { %v232_v52 = vld [vmem:[%s1003_s7 + $0x1c8] sm:$0xff]  ;;  %v628_v54 = vpack.c.bf16 %v214_v45, %v213_v44  ;;  %v183_v56 = vld [vmem:[%s1003_s7 + $0x40] sm:$0xff]  ;;  %v201_v61 = vld [vmem:[%s1003_s7 + $0xd0] sm:$0xff]  ;;  %p776_p12 = pnand %p775_p4, %p769_p5 }
  0x61   : > { %593 = vmatpush3.bf16.msra.mxu0 %v592_v34  ;;  %v184_v57 = vld [vmem:[%s1003_s7 + $0x48] sm:$0xff]  ;;  %v215_v58 = vld [vmem:[%s1003_s7 + $0x140] sm:$0xff]  ;;  %v630_v59 = vpack.c.bf16 %v232_v52, %v231_v51  ;;  %v202_v62 = vld [vmem:[%s1003_s7 + $0xd8] sm:$0xff] }
  0x62   : > { %625 = vmatpush3.bf16.msra.mxu1 %v624_v38  ;;  %595 = vmatprep.subr.bf16.mxu0 %v594_v39  ;;  %v216_v60 = vld [vmem:[%s1003_s7 + $0x148] sm:$0xff]  ;;  %v233_v1 = vld [vmem:[%s1003_s7 + $0x1d0] sm:$0xff]  ;;  %v234_v2 = vld [vmem:[%s1003_s7 + $0x1d8] sm:$0xff]  ;;  %v600_v3 = vpack.c.bf16 %v184_v57, %v183_v56  ;;  %v602_v5 = vpack.c.bf16 %v202_v62, %v201_v61 }
  0x63   : > { %627 = vmatprep.subr.bf16.mxu1 %v626_v43  ;;  %v632_v4 = vpack.c.bf16 %v216_v60, %v215_v58  ;;  %v185_v6 = vld [vmem:[%s1003_s7 + $0x50] sm:$0xff]  ;;  %v186_v7 = vld [vmem:[%s1003_s7 + $0x58] sm:$0xff]  ;;  %v634_v9 = vpack.c.bf16 %v234_v2, %v233_v1  ;;  %v203_v11 = vld [vmem:[%s1003_s7 + $0xe0] sm:$0xff] }
  0x64   : > { %v217_v8 = vld [vmem:[%s1003_s7 + $0x150] sm:$0xff]  ;;  %v218_v10 = vld [vmem:[%s1003_s7 + $0x158] sm:$0xff]  ;;  %v204_v12 = vld [vmem:[%s1003_s7 + $0xe8] sm:$0xff]  ;;  %v604_v16 = vpack.c.bf16 %v186_v7, %v185_v6 }
  0x65   : > { %597 = vmatpush3.bf16.msra.mxu0 %v596_v53  ;;  %v235_v14 = vld [vmem:[%s1003_s7 + $0x1e0] sm:$0xff]  ;;  %v236_v15 = vld [vmem:[%s1003_s7 + $0x1e8] sm:$0xff]  ;;  %v636_v18 = vpack.c.bf16 %v218_v10, %v217_v8  ;;  %v606_v19 = vpack.c.bf16 %v204_v12, %v203_v11  ;;  %v174_v22 = vld [vmem:[#allocation2] sm:$0xff] }
  0x66   : > { %629 = vmatpush3.bf16.msra.mxu1 %v628_v54  ;;  %599 = vmatprep.subr.bf16.mxu0 %v598_v55  ;;  %v187_v17 = vld [vmem:[%s1003_s7 + $0x60] sm:$0xff]  ;;  %v188_v20 = vld [vmem:[%s1003_s7 + $0x68] sm:$0xff]  ;;  %v638_v23 = vpack.c.bf16 %v236_v15, %v235_v14  ;;  %v205_v25 = vld [vmem:[%s1003_s7 + $0xf0] sm:$0xff]  ;;  %v247_v27 = vrot.slane %v174_v22, %v246_v13  ;;  %v240_v28 = vcombine.high %v174_v22, %v174_v22 }
  0x67   : > { %631 = vmatprep.subr.bf16.mxu1 %v630_v59  ;;  %v219_v21 = vld [vmem:[%s1003_s7 + $0x160] sm:$0xff]  ;;  %v220_v24 = vld [vmem:[%s1003_s7 + $0x168] sm:$0xff]  ;;  %v206_v26 = vld [vmem:[%s1003_s7 + $0xf8] sm:$0xff]  ;;  %v608_v31 = vpack.c.bf16 %v188_v20, %v187_v17 }
  0x68   : > { %v237_v29 = vld [vmem:[%s1003_s7 + $0x1f0] sm:$0xff]  ;;  %v238_v30 = vld [vmem:[%s1003_s7 + $0x1f8] sm:$0xff]  ;;  %v255_v32 = vcombine.high %v247_v27, %v247_v27  ;;  %v254_v33 = vrot.slane %v240_v28, %v246_v13  ;;  %v640_v34 = vpack.c.bf16 %v220_v24, %v219_v21  ;;  %v610_v35 = vpack.c.bf16 %v206_v26, %v205_v25 }
  0x69   : > { %601 = vmatpush3.bf16.msra.mxu0 %v600_v3  ;;  %v189_v36 = vld [vmem:[%s1003_s7 + $0x70] sm:$0xff]  ;;  %v190_v37 = vld [vmem:[%s1003_s7 + $0x78] sm:$0xff]  ;;  %v642_v38 = vpack.c.bf16 %v238_v30, %v237_v29 }
  0x6a   : > { %633 = vmatpush3.bf16.msra.mxu1 %v632_v4  ;;  %603 = vmatprep.subr.bf16.mxu0 %v602_v5  ;;  %v221_v39 = vld [vmem:[%s1003_s7 + $0x170] sm:$0xff]  ;;  %v222_v40 = vld [vmem:[%s1003_s7 + $0x178] sm:$0xff]  ;;  %v256_v41 = vcombine.high %v254_v33, %v254_v33  ;;  %v612_v42 = vpack.c.bf16 %v190_v37, %v189_v36 }
  0x6b   : > { %635 = vmatprep.subr.bf16.mxu1 %v634_v9  ;;  %325 = vmatprep.mubr.f32.mxu0 %v255_v32  ;;  %v644_v43 = vpack.c.bf16 %v222_v40, %v221_v39 }
  0x6c   : > { %395 = vmatprep.mubr.f32.mxu1 %v256_v41 }
  0x6d   : > { %605 = vmatpush3.bf16.msra.mxu0 %v604_v16 }
  0x6e   : > { %637 = vmatpush3.bf16.msra.mxu1 %v636_v18  ;;  %607 = vmatprep.subr.bf16.mxu0 %v606_v19 }
  0x6f   : > { %639 = vmatprep.subr.bf16.mxu1 %v638_v23 }
  0x71   : > { %609 = vmatpush3.bf16.msra.mxu0 %v608_v31 }
  0x72   : > { %641 = vmatpush3.bf16.msra.mxu1 %v640_v34  ;;  %611 = vmatprep.subr.bf16.mxu0 %v610_v35 }
  0x73   : > { %643 = vmatprep.subr.bf16.mxu1 %v642_v38 }
  0x75   : > { %613 = vmatpush3.bf16.msra.mxu0 %v612_v42 }
  0x76   : > { %645 = vmatpush3.bf16.msra.mxu1 %v644_v43 }
  0x78   : > { %326 = vmatmul.mubr.f32.vlgmr.msra.gmra.mrb[0].mxu0 %v247_v27 }
  0x79   : > { %396 = vmatmul.mubr.f32.vlgmr.msra.gmra.mrb[0].mxu1 %v254_v33 }
 0x14b   : > { %v544_v44 = vpop.f32.mrb[0].mxu0 }
 0x14c   : > { %v579_v45 = vpop.f32.mrb[0].mxu1  ;;  %v545_v46 = vpop.f32.mrb[1].mxu0 }
 0x14d   : > { %v546_v47 = vadd.f32 %v545_v46, %v544_v44  ;;  %v580_v48 = vpop.f32.mrb[1].mxu1 }
 0x14e   : > { %v581_v49 = vadd.f32 %v580_v48, %v579_v45 }
 0x150   : > { %v398_v50 = vadd.f32 %v581_v49, %v546_v47 }
 0x152   : > { %401 = vst [vmem:[%s173_s28] sm:$0x3] %v398_v50 }
 0x153   : > { %779 = shalt.err (!%p776_p12)
}
 0x154   : > { %s780_s19 = scalar_lea.hbm %s1078_s8, 32  ;;  %s784_s4 = scalar_lea.hbm %s1123_s2, 3296 }
 0x155   : > { %p781_p0 = scmp.ne.s32.totalorder %s1078_s8, %s780_s19  ;;  %p785_p13 = scmp.lt.u32.totalorder %s1078_s8, %s1123_s2 }
 0x156   : > { %p786_p7 = scmp.lt.u32.totalorder %s784_s4, %s780_s19  ;;  %p788_p8 = scmp.lt.u32.totalorder %s780_s19, %s1078_s8 }
 0x157   : > { %p782_p3 = pnand %p781_p0, %p1141_p9 }
 0x158   : > { %p787_p6 = por %p786_p7, %p785_p13 }
 0x159   : > { %p783_p11 = pneg %p782_p3 }
 0x15a   : > { %p789_p10 = por %p788_p8, %p787_p6 }
 0x15c   : > { %p790_p5 = pnand %p789_p10, %p783_p11 }
 0x15e   : > { %793 = shalt.err (!%p790_p5)
}
 0x15f   : > { %652 = dma.vmem_to_hbm [thread:$0]  (%p1141_p9), %s1080_s30, 32, %s1078_s8, %s403_s14  }
 0x160 PF: > { %p669_p1 = scmp.ge.s32.totalorder %s836_s12, 2  ;;  %s428_s29 = sand.u32 1, %s824_s9  }
 0x161   : > { %p1142_p2 = scmp.ne.s32.totalorder %s1132_s22, 0  ;;  %s429_s7 = scalar_lea.sflag [#allocation4], %s428_s29 }
 0x163   : > { %p663_p4 = pnand %p669_p1, %p1142_p2 }
 0x165   : > { %819 = dma.done.wait (!%p663_p4), %s429_s7, 32  }
 0x166   : > { %821 = vsyncadd (!%p663_p4), %s429_s7, 4294967264  ;;  %p16_p12 = scmp.ge.s32.totalorder %s885_s15, 105   ;;  %s1143_s9 = smov %s828_s10 }
 0x167   : > { %s1144_s10 = smov %s832_s11  ;;  %s1145_s11 = smov %s897_s18 }
 0x168   : > { %s1146_s12 = smov %s885_s15  ;;  %18 = sbr.rel (!%p16_p12) target bundleno = 6 (0x6), region = 78 }
 0x16f   :  { %434 = vsyncpa [#allocation3], 1 }
 0x170   :  { %436 = vsyncpa [#allocation3 + $0x1], 1 }
 0x171   :  { %437 = vsyncpa [#allocation6], 1 }
 0x172   :  { %439 = vsyncpa [#allocation6 + $0x1], 1 }
 0x173   :  { %440 = vsyncpa [#allocation4], 1 }
 0x174   :  { %442 = vsyncpa [#allocation4 + $0x1], 1 }

</bundles_post_ra>
